<compile_context>
chip_gen: v7x
topology: tpu7x:2x2x1
jax: 0.10.0
libtpu: 0.0.40
codegen_flags: <defaults>
</compile_context>

<pallas_src>
import functools

import jax
import jax.numpy as jnp
from jax.experimental import pallas as pl
from jax.experimental.pallas import tpu as pltpu


def _dice_sums_kernel(x_ref, t_ref, m_ref, a_ref, b_ref, c_ref, *,
                      nr, chunk, has_tail):
    """Accumulate per-(sub)row sums a=sum(p*t), b=sum(p*p), c=sum(t*t).

    Grid = (row_blocks [parallel], reduction_chunks [arbitrary]).  The output
    blocks (RB, 1) are revisited across the reduction axis and act as
    accumulators; they are written back to HBM when the row block changes.
    """
    k = pl.program_id(1)

    @pl.when(k == 0)
    def _init():
        a_ref[...] = jnp.zeros_like(a_ref)
        b_ref[...] = jnp.zeros_like(b_ref)
        c_ref[...] = jnp.zeros_like(c_ref)

    # Inputs stream from HBM in their native (possibly narrow) dtype; cast here.
    x = x_ref[...].astype(jnp.float32)
    t = t_ref[...].astype(jnp.float32)
    m = m_ref[...].astype(jnp.float32)

    if has_tail:
        # The last block overhangs the (unpadded) reduction axis; out-of-bounds
        # lanes hold unspecified bits (possibly NaN when viewed as float), so
        # gate every operand before any arithmetic.
        lane = jax.lax.broadcasted_iota(jnp.int32, x.shape, dimension=1)
        valid = (k * chunk + lane) < nr
        zero = jnp.zeros_like(x)
        x = jnp.where(valid, x, zero)
        t = jnp.where(valid, t, zero)
        m = jnp.where(valid, m, zero)

    p = jax.nn.sigmoid(x) * m          # EUP (exp/recip) + VPU
    tm = t * m
    # Partial reduction each step: a tree of VALU vreg adds plus one XLU lane
    # collapse per sum; both units have slack in this HBM-bound kernel.
    a_ref[...] += jnp.sum(p * tm, axis=1, keepdims=True)
    b_ref[...] += jnp.sum(p * p, axis=1, keepdims=True)
    c_ref[...] += jnp.sum(tm * tm, axis=1, keepdims=True)


def dice_loss_pallas(inp, target, mask, *, loss_weight=1.0, reduce=True,
                     chunk=32768):
    """Computes DiceLoss.forward(input, target, mask, reduce)."""
    B = inp.shape[0]
    x = inp.reshape(B, -1)
    t = target.reshape(B, -1)
    m = mask.reshape(B, -1)
    # Keep narrow dtypes in HBM (no wrapper f32 upcast pass); only bools are
    # converted to int8 to keep the in-kernel load/convert path simple.
    if t.dtype == jnp.bool_:
        t = t.astype(jnp.int8)
    if m.dtype == jnp.bool_:
        m = m.astype(jnp.int8)
    N = x.shape[1]

    # Sublane packing: with B < 8 only B of 8 sublanes of each vreg carry data,
    # so split each batch row into G contiguous sub-rows (free, row-major).
    G = 1
    if B < 8:
        g = max(1, 8 // B)
        if N % g == 0:
            G = g
    R = B * G
    Nr = N // G
    x = x.reshape(R, Nr)
    t = t.reshape(R, Nr)
    m = m.reshape(R, Nr)

    # Row tiling: outer, parallel axis (shards rows across TensorCores on
    # multi-core chips; also bounds per-step VMEM for large batches).  Block
    # rows must be a multiple of 8 or the full row extent.
    RB = 8 if R % 8 == 0 else R
    n_row_blocks = R // RB

    # Lane tiling: biggest chunk that (a) was requested, (b) covers the row,
    # (c) keeps the double-buffered input blocks within a conservative budget.
    in_bytes = x.dtype.itemsize + t.dtype.itemsize + m.dtype.itemsize
    budget = 16 * 1024 * 1024
    cap = budget // (2 * RB * in_bytes)
    chunk = max(128, (min(int(chunk), cap) // 128) * 128)
    nr_up = ((Nr + 127) // 128) * 128
    chunk = min(chunk, nr_up)
    n_chunks = pl.cdiv(Nr, chunk)
    has_tail = (Nr % chunk) != 0

    kernel = functools.partial(_dice_sums_kernel, nr=Nr, chunk=chunk,
                               has_tail=has_tail)

    sums_shape = jax.ShapeDtypeStruct((R, 1), jnp.float32)
    in_spec = pl.BlockSpec((RB, chunk), lambda i, k: (i, k))
    out_spec = pl.BlockSpec((RB, 1), lambda i, k: (i, 0))

    a, b, c = pl.pallas_call(
        kernel,
        out_shape=(sums_shape, sums_shape, sums_shape),
        grid_spec=pltpu.PrefetchScalarGridSpec(
            num_scalar_prefetch=0,
            grid=(n_row_blocks, n_chunks),
            in_specs=[in_spec, in_spec, in_spec],
            out_specs=[out_spec, out_spec, out_spec],
        ),
        compiler_params=pltpu.CompilerParams(
            dimension_semantics=("parallel", "arbitrary"),
            # Safe on every generation (v5e/v6e 128 MiB, v7x 64 MiB physical);
            # actual use is a few MiB of double-buffered inputs + temporaries.
            vmem_limit_bytes=32 * 1024 * 1024),
    )(x, t, m)

    # Fold the G sub-rows back into each batch row, then form the dice coeff.
    a = a.reshape(B, G).sum(axis=1)
    b = b.reshape(B, G).sum(axis=1)
    c = c.reshape(B, G).sum(axis=1)
    d = 2.0 * a / (b + c + 1e-4)
    loss = loss_weight * (1.0 - d)
    return jnp.mean(loss) if reduce else loss


def _reference(inp, target, mask, loss_weight=1.0, reduce=True):
    B = inp.shape[0]
    p = jax.nn.sigmoid(inp.astype(jnp.float32)).reshape(B, -1)
    t = target.reshape(B, -1).astype(jnp.float32)
    m = mask.reshape(B, -1).astype(jnp.float32)
    p = p * m
    t = t * m
    a = jnp.sum(p * t, axis=1)
    b = jnp.sum(p * p, axis=1)
    c = jnp.sum(t * t, axis=1)
    d = 2.0 * a / (b + c + 1e-4)
    loss = loss_weight * (1.0 - d)
    return jnp.mean(loss) if reduce else loss


if __name__ == "__main__":
    key = jax.random.PRNGKey(0)
    loss_weight = 0.7  # deterministic "parameter" from __init__(loss_weight)

    def make_inputs(k, shape, dtype):
        k1, k2, k3 = jax.random.split(k, 3)
        inp = jax.random.normal(k1, shape, dtype=jnp.float32).astype(dtype)
        target = (jax.random.uniform(k2, shape) > 0.5).astype(dtype)
        mask = (jax.random.uniform(k3, shape) > 0.3).astype(dtype)
        return inp, target, mask

    cases = [
        # (shape,            dtype,        reduce, chunk)
        ((2, 4, 16, 16), jnp.float32, True, 32768),   # canonical module shape
        ((2, 4, 16, 16), jnp.float32, False, 32768),  # reduce=False path
        ((2, 4, 18, 18), jnp.float32, True, 128),     # multi-step + tail mask
        ((2, 3, 10, 10), jnp.bfloat16, True, 32768),  # narrow dtype + tail mask
        ((8, 4, 16, 16), jnp.float32, True, 32768),   # B >= 8 (no sub-row packing)
    ]
    keys = jax.random.split(key, len(cases))
    for ck, (shape, dtype, do_reduce, ch) in zip(keys, cases):
        inp, target, mask = make_inputs(ck, shape, dtype)
        out = dice_loss_pallas(inp, target, mask, loss_weight=loss_weight,
                               reduce=do_reduce, chunk=ch)
        out = jax.block_until_ready(out)
        ref = _reference(inp, target, mask, loss_weight=loss_weight,
                         reduce=do_reduce)
        assert jnp.allclose(out, ref, atol=1e-5, rtol=1e-5), (shape, out, ref)

    print("KERNEL_OK")
</pallas_src>

<mosaic_0001>
module attributes {stable_mosaic.version = 11 : i64} {
  func.func @_dice_sums_kernel(%arg0: i32, %arg1: i32, %arg2: memref<8x256xf32, #tpu.memory_space<vmem>>, %arg3: memref<8x256xf32, #tpu.memory_space<vmem>>, %arg4: memref<8x256xf32, #tpu.memory_space<vmem>>, %arg5: memref<8x1xf32, #tpu.memory_space<vmem>>, %arg6: memref<8x1xf32, #tpu.memory_space<vmem>>, %arg7: memref<8x1xf32, #tpu.memory_space<vmem>>) attributes {dimension_semantics = [#tpu.dimension_semantics<parallel>, #tpu.dimension_semantics<arbitrary>], iteration_bounds = array<i64: 1, 1>, scalar_prefetch = 0 : i64, scratch_operands = 0 : i64, tpu.core_type = #tpu.core_type<tc>, window_params = [{transform_indices = @transform_0, window_bounds = array<i64: 8, 256>}, {transform_indices = @transform_1, window_bounds = array<i64: 8, 256>}, {transform_indices = @transform_2, window_bounds = array<i64: 8, 256>}, {transform_indices = @transform_3, window_bounds = array<i64: 8, 1>}, {transform_indices = @transform_4, window_bounds = array<i64: 8, 1>}, {transform_indices = @transform_5, window_bounds = array<i64: 8, 1>}]} {
    %c0_i32 = arith.constant 0 : i32
    %0 = arith.cmpi eq, %arg1, %c0_i32 : i32
    %1 = arith.extui %0 : i1 to i32
    %c0_i32_0 = arith.constant 0 : i32
    %2 = arith.cmpi ne, %1, %c0_i32_0 : i32
    scf.if %2 {
      %cst_21 = arith.constant 0.000000e+00 : f32
      %31 = vector.broadcast %cst_21 : f32 to vector<8x1xf32>
      %c0_22 = arith.constant 0 : index
      %c0_23 = arith.constant 0 : index
      %32 = vector.load %arg5[%c0_22, %c0_23] : memref<8x1xf32, #tpu.memory_space<vmem>>, vector<8x1xf32>
      tpu.vector_store %arg5[%c0_22, %c0_23], %31 {strides = array<i32>} : memref<8x1xf32, #tpu.memory_space<vmem>>, vector<8x1xf32>,
      %cst_24 = arith.constant 0.000000e+00 : f32
      %33 = vector.broadcast %cst_24 : f32 to vector<8x1xf32>
      %c0_25 = arith.constant 0 : index
      %c0_26 = arith.constant 0 : index
      %34 = vector.load %arg6[%c0_25, %c0_26] : memref<8x1xf32, #tpu.memory_space<vmem>>, vector<8x1xf32>
      tpu.vector_store %arg6[%c0_25, %c0_26], %33 {strides = array<i32>} : memref<8x1xf32, #tpu.memory_space<vmem>>, vector<8x1xf32>,
      %cst_27 = arith.constant 0.000000e+00 : f32
      %35 = vector.broadcast %cst_27 : f32 to vector<8x1xf32>
      %c0_28 = arith.constant 0 : index
      %c0_29 = arith.constant 0 : index
      %36 = vector.load %arg7[%c0_28, %c0_29] : memref<8x1xf32, #tpu.memory_space<vmem>>, vector<8x1xf32>
      tpu.vector_store %arg7[%c0_28, %c0_29], %35 {strides = array<i32>} : memref<8x1xf32, #tpu.memory_space<vmem>>, vector<8x1xf32>,
    } else {
    }
    %c0 = arith.constant 0 : index
    %c0_1 = arith.constant 0 : index
    %3 = vector.load %arg2[%c0, %c0_1] : memref<8x256xf32, #tpu.memory_space<vmem>>, vector<8x256xf32>
    %c0_2 = arith.constant 0 : index
    %c0_3 = arith.constant 0 : index
    %4 = vector.load %arg3[%c0_2, %c0_3] : memref<8x256xf32, #tpu.memory_space<vmem>>, vector<8x256xf32>
    %c0_4 = arith.constant 0 : index
    %c0_5 = arith.constant 0 : index
    %5 = vector.load %arg4[%c0_4, %c0_5] : memref<8x256xf32, #tpu.memory_space<vmem>>, vector<8x256xf32>
    %6 = arith.negf %3 : vector<8x256xf32>
    %7 = math.exp %6 : vector<8x256xf32>
    %cst = arith.constant 1.000000e+00 : f32
    %8 = vector.broadcast %cst : f32 to vector<8x256xf32>
    %9 = arith.addf %8, %7 : vector<8x256xf32>
    %10 = arith.divf %8, %9 : vector<8x256xf32>
    %11 = arith.mulf %10, %5 : vector<8x256xf32>
    %12 = arith.mulf %4, %5 : vector<8x256xf32>
    %c0_6 = arith.constant 0 : index
    %c0_7 = arith.constant 0 : index
    %13 = vector.load %arg5[%c0_6, %c0_7] : memref<8x1xf32, #tpu.memory_space<vmem>>, vector<8x1xf32>
    %14 = arith.mulf %11, %12 : vector<8x256xf32>
    %cst_8 = arith.constant dense<0.000000e+00> : vector<8xf32>
    %15 = vector.multi_reduction <add>, %14, %cst_8 [1] : vector<8x256xf32> to vector<8xf32>
    %16 = vector.shape_cast %15 : vector<8xf32> to vector<8x1xf32>
    %17 = arith.addf %13, %16 : vector<8x1xf32>
    %c0_9 = arith.constant 0 : index
    %c0_10 = arith.constant 0 : index
    %18 = vector.load %arg5[%c0_9, %c0_10] : memref<8x1xf32, #tpu.memory_space<vmem>>, vector<8x1xf32>
    tpu.vector_store %arg5[%c0_9, %c0_10], %17 {strides = array<i32>} : memref<8x1xf32, #tpu.memory_space<vmem>>, vector<8x1xf32>,
    %c0_11 = arith.constant 0 : index
    %c0_12 = arith.constant 0 : index
    %19 = vector.load %arg6[%c0_11, %c0_12] : memref<8x1xf32, #tpu.memory_space<vmem>>, vector<8x1xf32>
    %20 = arith.mulf %11, %11 : vector<8x256xf32>
    %cst_13 = arith.constant dense<0.000000e+00> : vector<8xf32>
    %21 = vector.multi_reduction <add>, %20, %cst_13 [1] : vector<8x256xf32> to vector<8xf32>
    %22 = vector.shape_cast %21 : vector<8xf32> to vector<8x1xf32>
    %23 = arith.addf %19, %22 : vector<8x1xf32>
    %c0_14 = arith.constant 0 : index
    %c0_15 = arith.constant 0 : index
    %24 = vector.load %arg6[%c0_14, %c0_15] : memref<8x1xf32, #tpu.memory_space<vmem>>, vector<8x1xf32>
    tpu.vector_store %arg6[%c0_14, %c0_15], %23 {strides = array<i32>} : memref<8x1xf32, #tpu.memory_space<vmem>>, vector<8x1xf32>,
    %c0_16 = arith.constant 0 : index
    %c0_17 = arith.constant 0 : index
    %25 = vector.load %arg7[%c0_16, %c0_17] : memref<8x1xf32, #tpu.memory_space<vmem>>, vector<8x1xf32>
    %26 = arith.mulf %12, %12 : vector<8x256xf32>
    %cst_18 = arith.constant dense<0.000000e+00> : vector<8xf32>
    %27 = vector.multi_reduction <add>, %26, %cst_18 [1] : vector<8x256xf32> to vector<8xf32>
    %28 = vector.shape_cast %27 : vector<8xf32> to vector<8x1xf32>
    %29 = arith.addf %25, %28 : vector<8x1xf32>
    %c0_19 = arith.constant 0 : index
    %c0_20 = arith.constant 0 : index
    %30 = vector.load %arg7[%c0_19, %c0_20] : memref<8x1xf32, #tpu.memory_space<vmem>>, vector<8x1xf32>
    tpu.vector_store %arg7[%c0_19, %c0_20], %29 {strides = array<i32>} : memref<8x1xf32, #tpu.memory_space<vmem>>, vector<8x1xf32>,
    return
  }
  func.func @transform_0(%arg0: i32, %arg1: i32) -> (i32, i32) {
    %c0_i32 = arith.constant 0 : i32
    return %arg0, %arg1 : i32, i32
  }
  func.func @transform_1(%arg0: i32, %arg1: i32) -> (i32, i32) {
    %c0_i32 = arith.constant 0 : i32
    return %arg0, %arg1 : i32, i32
  }
  func.func @transform_2(%arg0: i32, %arg1: i32) -> (i32, i32) {
    %c0_i32 = arith.constant 0 : i32
    return %arg0, %arg1 : i32, i32
  }
  func.func @transform_3(%arg0: i32, %arg1: i32) -> (i32, i32) {
    %c0_i32 = arith.constant 0 : i32
    %c0_i32_0 = arith.constant 0 : i32
    return %arg0, %c0_i32 : i32, i32
  }
  func.func @transform_4(%arg0: i32, %arg1: i32) -> (i32, i32) {
    %c0_i32 = arith.constant 0 : i32
    %c0_i32_0 = arith.constant 0 : i32
    return %arg0, %c0_i32 : i32, i32
  }
  func.func @transform_5(%arg0: i32, %arg1: i32) -> (i32, i32) {
    %c0_i32 = arith.constant 0 : i32
    %c0_i32_0 = arith.constant 0 : i32
    return %arg0, %c0_i32 : i32, i32
  }
}

</mosaic_0001>

<bundles_post_ra>
// kernel: tpu_custom_call.1
= control target key start
LH: loop header
LB: loop body
LE: loop exit
PB: predicated region body
PF: predicated region fallthrough
CT: control target
= control target key end

     0   :  { %11 = vsyncpa [#allocation3], 0  ;;  %s308_s0 = inlined_call_operand.hbm [shape: f32[8,256], index: 0, kind: input, shape index: {}]   ;;  %s309_s1 = inlined_call_operand.hbm [shape: f32[8,256], index: 1, kind: input, shape index: {}]   ;;  %s310_s2 = inlined_call_operand.hbm [shape: f32[8,256], index: 2, kind: input, shape index: {}]   ;;  %s311_s3 = inlined_call_operand.vmem [shape: f32[8,1], index: 3, kind: output, shape index: {0}]   ;;  %s312_s4 = inlined_call_operand.vmem [shape: f32[8,1], index: 4, kind: output, shape index: {1}]   ;;  %s313_s5 = inlined_call_operand.vmem [shape: f32[8,1], index: 5, kind: output, shape index: {2}]  }
   0x1   :  { %12 = vsyncpa [#allocation5], 0  ;;  %s205_s18 = smov [#allocation4]   ;;  %s206_s20 = smov [#allocation2]  }
   0x2   :  { %s29_s19 = sshll.u32 %s205_s18, 4  ;;  %s19_s21 = sshll.u32 %s206_s20, 4  ;;  %s30_s19 = int_to_ptr.vmem [resolvable:$true] %s29_s19  ;;  %s20_s21 = int_to_ptr.vmem [resolvable:$true] %s19_s21 }
   0x3   :  { %s135_s24 = scalar_lea.hbm %s309_s1, 256 }
   0x4   :  { %p136_p0 = scmp.ne.s32.totalorder %s309_s1, %s135_s24  ;;  %p139_p1 = scmp.lt.u32.totalorder %s135_s24, %s309_s1 }
   0x6   :  { %p141_p2 = pnand %p139_p1, %p136_p0 }
   0x8   :  { %144 = shalt.err (!%p141_p2)
}
   0x9   :  { %s145_s29 = scalar_lea.vmem %s30_s19, 256  ;;  %p150_p4 = scmp.lt.s32.totalorder %s30_s19, %s30_s19 }
   0xa   :  { %p146_p3 = scmp.ne.s32.totalorder %s30_s19, %s145_s29  ;;  %p151_p5 = scmp.lt.s32.totalorder %s145_s29, %s145_s29 }
   0xc   :  { %p152_p6 = por %p151_p5, %p150_p4 }
   0xe   :  { %p153_p7 = pnand %p152_p6, %p146_p3 }
  0x10   :  { %156 = shalt.err (!%p153_p7)
}
  0x11   :  { %32 = dma.hbm_to_vmem [thread:$0]  %s309_s1, 256, %s30_s19, [#allocation5]  }
  0x12   :  { %s157_s9 = scalar_lea.hbm %s308_s0, 256 }
  0x13   :  { %p158_p8 = scmp.ne.s32.totalorder %s308_s0, %s157_s9  ;;  %p161_p9 = scmp.lt.u32.totalorder %s157_s9, %s308_s0 }
  0x15   :  { %p163_p10 = pnand %p161_p9, %p158_p8 }
  0x17   :  { %166 = shalt.err (!%p163_p10)
}
  0x18   :  { %s167_s14 = scalar_lea.vmem %s20_s21, 256  ;;  %p172_p12 = scmp.lt.s32.totalorder %s20_s21, %s20_s21 }
  0x19   :  { %p168_p11 = scmp.ne.s32.totalorder %s20_s21, %s167_s14  ;;  %p173_p13 = scmp.lt.s32.totalorder %s167_s14, %s167_s14 }
  0x1b   :  { %p174_p0 = por %p173_p13, %p172_p12 }
  0x1d   :  { %p175_p1 = pnand %p174_p0, %p168_p11 }
  0x1f   :  { %178 = shalt.err (!%p175_p1)
}
  0x20   :  { %22 = dma.hbm_to_vmem [thread:$0]  %s308_s0, 256, %s20_s21, [#allocation3]  }
  0x21   :  { %s207_s16 = smov [#allocation6]   ;;  %s179_s20 = scalar_lea.hbm %s310_s2, 256 }
  0x22   :  { %s39_s17 = sshll.u32 %s207_s16, 4  ;;  %p180_p2 = scmp.ne.s32.totalorder %s310_s2, %s179_s20  ;;  %s40_s17 = int_to_ptr.vmem [resolvable:$true] %s39_s17 }
  0x23   :  { %p183_p3 = scmp.lt.u32.totalorder %s179_s20, %s310_s2 }
  0x25   :  { %p185_p4 = pnand %p183_p3, %p180_p2 }
  0x27   :  { %188 = shalt.err (!%p185_p4)
}
  0x28   :  { %s189_s26 = scalar_lea.vmem %s40_s17, 256  ;;  %p194_p6 = scmp.lt.s32.totalorder %s40_s17, %s40_s17 }
  0x29   :  { %p190_p5 = scmp.ne.s32.totalorder %s40_s17, %s189_s26  ;;  %p195_p7 = scmp.lt.s32.totalorder %s189_s26, %s189_s26 }
  0x2b   :  { %p196_p8 = por %p195_p7, %p194_p6 }
  0x2d   :  { %p197_p9 = pnand %p196_p8, %p190_p5 }
  0x2f   :  { %200 = shalt.err (!%p197_p9)
}
  0x30   :  { %42 = dma.hbm_to_vmem [thread:$0]  %s310_s2, 256, %s40_s17, [#allocation5]  }
  0x31   :  { %201 = dma.done.wait [#allocation3], 256  }
  0x32   :  { %202 = vsyncadd [#allocation3], 4294967040 }
  0x33   :  { %203 = dma.done.wait [#allocation5], 512  }
  0x34   :  { %204 = vsyncadd [#allocation5], 4294966784  ;;  %vm56_vm0 = vcmask 7168   ;;  %v208_v0 = vmov 0.0   ;;  %v60_v1 = vld [vmem:[#allocation2] sm:$0xff]  ;;  %v61_v2 = vld [vmem:[#allocation2 + $0x8] sm:$0xff] }
  0x35   :  { %57 = vst.msk [vmem:[%s311_s3] sm:$0xff] %vm56_vm0, %v208_v0  ;;  %58 = vst.msk [vmem:[%s312_s4] sm:$0xff] %vm56_vm0, %v208_v0  ;;  %v62_v3 = vld [vmem:[#allocation4] sm:$0xff]  ;;  %v63_v4 = vld [vmem:[#allocation4 + $0x8] sm:$0xff]  ;;  %v121_v7 = vmul.f32 -1.442695, %v60_v1 }
  0x36   :  { %59 = vst.msk [vmem:[%s313_s5] sm:$0xff] %vm56_vm0, %v208_v0  ;;  %v64_v5 = vld [vmem:[#allocation6] sm:$0xff]  ;;  %v65_v6 = vld [vmem:[#allocation6 + $0x8] sm:$0xff]  ;;  %v122_v8 = vmul.f32 -1.442695, %v61_v2 }
  0x37   :  { %v80_v9 = vmul.f32 %v64_v5, %v62_v3  ;;  %v81_v10 = vmul.f32 %v65_v6, %v63_v4  ;;  %127 = vpow2.f32 %v121_v7 }
  0x38   :  { %129 = vpow2.f32 %v122_v8 }
  0x39   :  { %v100_v11 = vmul.f32 %v80_v9, %v80_v9  ;;  %v101_v12 = vmul.f32 %v81_v10, %v81_v10 }
  0x3b   :  { %v102_v13 = vadd.f32 %v101_v12, %v100_v11 }
  0x3c   :  { %v82_v31 = vld [vmem:[%s311_s3] sm:$0xff] }
  0x3d   :  { %103 = vadd.xlane.f32.xlu1 %v102_v13  ;;  %v99_v28 = vld [vmem:[%s313_s5] sm:$0xff] }
  0x3e   :  { %v91_v34 = vld [vmem:[%s312_s4] sm:$0xff] }
  0x41   :  { %v128_v14 = vpop.eup %127 }
  0x42   :  { %v130_v15 = vpop.eup %129  ;;  %v72_v16 = vadd.f32 1.0, %v128_v14 }
  0x43   :  { %v73_v17 = vadd.f32 1.0, %v130_v15 }
  0x44   :  { %131 = vrcp.f32 %v72_v16 }
  0x45   :  { %133 = vrcp.f32 %v73_v17 }
  0x4e   :  { %v132_v18 = vpop.eup %131 }
  0x4f   :  { %v134_v19 = vpop.eup %133  ;;  %v78_v20 = vmul.f32 %v132_v18, %v64_v5 }
  0x50   :  { %v79_v21 = vmul.f32 %v134_v19, %v65_v6 }
  0x51   :  { %v83_v22 = vmul.f32 %v80_v9, %v78_v20  ;;  %v92_v24 = vmul.f32 %v78_v20, %v78_v20 }
  0x52   :  { %v84_v23 = vmul.f32 %v81_v10, %v79_v21  ;;  %v93_v25 = vmul.f32 %v79_v21, %v79_v21 }
  0x54   :  { %v85_v26 = vadd.f32 %v84_v23, %v83_v22  ;;  %v94_v27 = vadd.f32 %v93_v25, %v92_v24 }
  0x56   :  { %86 = vadd.xlane.f32.xlu0 %v85_v26 }
  0x5a   :  { %95 = vadd.xlane.f32.xlu0 %v94_v27 }
  0xca   :  { %v104_v29 = vpop.xlane.xlu1 %103 }
  0xcb   :  { %v105_v30 = vadd.f32 %v104_v29, %v99_v28 }
  0xcd   :  { %106 = vst.msk [vmem:[%s313_s5] sm:$0xff] %vm56_vm0, %v105_v30 }
  0xe3   :  { %v87_v32 = vpop.xlane.xlu0 %86 }
  0xe4   :  { %v88_v33 = vadd.f32 %v87_v32, %v82_v31 }
  0xe6   :  { %90 = vst.msk [vmem:[%s311_s3] sm:$0xff] %vm56_vm0, %v88_v33 }
  0xe7   :  { %v96_v35 = vpop.xlane.xlu0 %95 }
  0xe8   :  { %v97_v36 = vadd.f32 %v96_v35, %v91_v34 }
  0xea   :  { %98 = vst.msk [vmem:[%s312_s4] sm:$0xff] %vm56_vm0, %v97_v36 }
  0xeb   :  { %119 = vsyncpa [#allocation3], 1 }
  0xec   :  { %120 = vsyncpa [#allocation5], 1 }

</bundles_post_ra>
